<compile_context>
chip_gen: v6e
topology: v6e:2x2x1
jax: 0.10.0
libtpu: 0.0.40
codegen_flags: <defaults>
</compile_context>

<pallas_src>
import functools

import jax
import jax.numpy as jnp
from jax import lax
from jax.experimental import pallas as pl
from jax.experimental.pallas import tpu as pltpu


def _vmem_capacity_bytes():
    """Physical VMEM capacity per core; conservative fallback if the query fails."""
    try:
        info = pltpu.get_tpu_info()
        for name in ("vmem_capacity_bytes", "vmem_size_bytes", "vmem_bytes"):
            val = getattr(info, name, None)
            if val:
                return int(val)
    except Exception:
        pass
    return 64 * 1024 * 1024  # v7x-sized conservative default


def _choose_cout_tile(cout, cap=512):
    """Largest divisor of Cout that is a multiple of 8 and <= cap (else full Cout)."""
    if cout <= cap:
        return cout
    for t in range(cap - cap % 8, 7, -8):
        if cout % t == 0:
            return t
    return cout


def _choose_lane_tile(l_total, bytes_per_lane, budget_bytes, cap=8192):
    """Pick the spatial (lane) tile: full extent when small/fits, else a 256-multiple."""
    if l_total <= 256 or (l_total <= cap and l_total * bytes_per_lane <= budget_bytes):
        return l_total
    tl = min(cap, max(256, (min(cap, l_total) // 256) * 256))
    while tl > 256 and tl * bytes_per_lane > budget_bytes:
        tl -= 256
    if tl * bytes_per_lane > budget_bytes:
        tl = 128
    return tl


def _stats_kernel(x_ref, g_ref, s_ref, *, tl, l_total):
    """Pass 1: accumulate the input Gram matrix X X^T and the per-channel input sum.

    Grid = (lane-tiles [parallel], batch [arbitrary, accumulated]).  The conv output is
    never formed; pass-1 MXU work is M*Cin^2 instead of M*Cin*Cout.
    """
    n = pl.program_id(1)

    @pl.when(n == 0)
    def _():
        g_ref[...] = jnp.zeros_like(g_ref)
        s_ref[...] = jnp.zeros_like(s_ref)

    x = x_ref[...]  # (Cin, tl)
    if l_total % tl != 0:
        # NOTE: this mask runs on EVERY tile when L is not tile-aligned; it is cheap VPU
        # filler hidden under the MXU/DMA (only the last tile actually has OOB lanes).
        lane = pl.program_id(0) * tl + lax.broadcasted_iota(jnp.int32, (1, tl), 1)
        x = jnp.where(lane < l_total, x, jnp.zeros_like(x))

    g_ref[...] += lax.dot_general(x, x, (((1,), (1,)), ((), ())),
                                  preferred_element_type=jnp.float32)     # (Cin, Cin)
    s_ref[...] += jnp.sum(x.astype(jnp.float32), axis=1, keepdims=True)   # (Cin, 1)


def _conv_bn_kernel(x_ref, w_ref, scale_ref, shift_ref, o_ref):
    """Pass 2: recompute the 1x1-conv tile and apply folded BN (y*scale + shift)."""
    y = jnp.dot(w_ref[...], x_ref[...], preferred_element_type=jnp.float32)  # (TCo, tl)
    o_ref[...] = (y * scale_ref[...] + shift_ref[...]).astype(o_ref.dtype)


def downsample_layer_forward(x, weight, gamma, beta, *, stride=1, eps=1e-5,
                             compute_dtype=None, out_dtype=None, return_stats=False):
    """x: (N, Cin, H, W) NCHW.  weight: (Cout, Cin, 1, 1).  gamma/beta: (Cout,)."""
    N, Cin, H, W = x.shape
    Cout = weight.shape[0]

    # kernel_size=1, no padding: stride == spatial subsample + per-sample channel matmul.
    xs = x[:, :, ::stride, ::stride] if stride != 1 else x
    Ho, Wo = xs.shape[2], xs.shape[3]
    L = Ho * Wo
    M = N * L

    cdt = compute_dtype if compute_dtype is not None else x.dtype
    odt = out_dtype if out_dtype is not None else x.dtype

    x3 = xs.reshape(N, Cin, L).astype(cdt)        # free reshape for stride == 1
    w2 = weight.reshape(Cout, Cin)
    w_mm = w2.astype(cdt)

    item = jnp.dtype(cdt).itemsize
    oitem = jnp.dtype(odt).itemsize

    cap = _vmem_capacity_bytes()
    vmem_limit = int(cap * 0.75)                  # 48 MiB on v7x, 96 MiB on v5e/v6e
    budget = int(cap * 0.5)                       # tile-sizing budget (headroom left)

    # ---------------- Pass 1: Gram-matrix batch statistics ----------------
    p1_fixed = 2 * (Cin * Cin + Cin) * 4          # double-buffered f32 partial outputs
    tl1 = _choose_lane_tile(L, 2 * Cin * item, max(budget - p1_fixed, 1 << 20))
    nl1 = pl.cdiv(L, tl1)

    cost1 = pl.CostEstimate(
        flops=2 * M * Cin * Cin + M * Cin,
        transcendentals=0,
        bytes_accessed=M * Cin * item + nl1 * (Cin * Cin + Cin) * 4)

    g_parts, s_parts = pl.pallas_call(
        functools.partial(_stats_kernel, tl=tl1, l_total=L),
        out_shape=(jax.ShapeDtypeStruct((nl1, Cin, Cin), jnp.float32),
                   jax.ShapeDtypeStruct((nl1, Cin, 1), jnp.float32)),
        grid_spec=pltpu.PrefetchScalarGridSpec(
            num_scalar_prefetch=0,
            grid=(nl1, N),
            in_specs=[pl.BlockSpec((None, Cin, tl1), lambda li, n: (n, 0, li))],
            out_specs=[pl.BlockSpec((None, Cin, Cin), lambda li, n: (li, 0, 0)),
                       pl.BlockSpec((None, Cin, 1), lambda li, n: (li, 0, 0))],
        ),
        compiler_params=pltpu.CompilerParams(
            dimension_semantics=("parallel", "arbitrary"),
            vmem_limit_bytes=vmem_limit),
        cost_estimate=cost1,
    )(x3)

    # ---------------- Glue: fold BN into per-channel scale / shift ----------------
    g = jnp.sum(g_parts, axis=0)                       # (Cin, Cin)
    sx = jnp.sum(s_parts, axis=0)[:, 0]                # (Cin,)
    w2f = w2.astype(jnp.float32)
    mean = (w2f @ sx) / M                              # (Cout,)  E[y]
    sumsq = jnp.sum((w2f @ g) * w2f, axis=1)           # (Cout,)  sum(y^2) = w^T G w
    var = jnp.maximum(sumsq / M - mean * mean, 0.0)    # biased (training-mode) variance
    rstd = lax.rsqrt(var + eps)
    scale = gamma.astype(jnp.float32) * rstd
    shift = beta.astype(jnp.float32) - mean * scale
    scale2 = scale.reshape(Cout, 1)
    shift2 = shift.reshape(Cout, 1)

    # ---------------- Pass 2: conv recompute + fused BN epilogue ----------------
    tco = _choose_cout_tile(Cout)
    nco = pl.cdiv(Cout, tco)
    p2_fixed = 2 * tco * Cin * item + 4 * tco * 4      # dbl-buffered W + scale/shift
    tl2 = _choose_lane_tile(L, 2 * Cin * item + 2 * tco * oitem,
                            max(budget - p2_fixed, 1 << 20))
    nl2 = pl.cdiv(L, tl2)

    cost2 = pl.CostEstimate(
        flops=2 * M * Cin * Cout + 2 * M * Cout,
        transcendentals=0,
        bytes_accessed=M * Cin * item + Cout * Cin * item + M * Cout * oitem)

    out3 = pl.pallas_call(
        _conv_bn_kernel,
        out_shape=jax.ShapeDtypeStruct((N, Cout, L), odt),
        grid_spec=pltpu.PrefetchScalarGridSpec(
            num_scalar_prefetch=0,
            grid=(N, nco, nl2),
            in_specs=[
                pl.BlockSpec((None, Cin, tl2), lambda n, c, l: (n, 0, l)),
                pl.BlockSpec((tco, Cin), lambda n, c, l: (c, 0)),
                pl.BlockSpec((tco, 1), lambda n, c, l: (c, 0)),
                pl.BlockSpec((tco, 1), lambda n, c, l: (c, 0)),
            ],
            out_specs=pl.BlockSpec((None, tco, tl2), lambda n, c, l: (n, c, l)),
        ),
        compiler_params=pltpu.CompilerParams(
            dimension_semantics=("parallel", "parallel", "parallel"),
            vmem_limit_bytes=vmem_limit),
        cost_estimate=cost2,
    )(x3, w_mm, scale2, shift2)

    out = out3.reshape(N, Cout, Ho, Wo)                # free reshape (NCHW)
    if return_stats:
        # NOTE: PyTorch's running_var update uses the unbiased variance (factor M/(M-1)).
        return out, mean, var
    return out


def _reference(x, weight, gamma, beta, stride=1, eps=1e-5):
    # Pure-JAX reference: 1x1 conv (stride, no bias) + training-mode BatchNorm2d.
    xs = x[:, :, ::stride, ::stride] if stride != 1 else x
    w2 = weight.reshape(weight.shape[0], weight.shape[1])
    y = jnp.einsum('nchw,oc->nohw', xs, w2)
    mean = jnp.mean(y, axis=(0, 2, 3), keepdims=True)
    var = jnp.mean((y - mean) ** 2, axis=(0, 2, 3), keepdims=True)
    g = gamma.reshape(1, -1, 1, 1)
    b = beta.reshape(1, -1, 1, 1)
    return (y - mean) * lax.rsqrt(var + eps) * g + b


if __name__ == "__main__":
    key = jax.random.PRNGKey(0)
    kx, kw, kg, kb = jax.random.split(key, 4)

    N, Cin, H, W = 2, 4, 16, 16
    Cout = 8

    x = jax.random.normal(kx, (N, Cin, H, W), dtype=jnp.float32)
    weight = jax.random.normal(kw, (Cout, Cin, 1, 1), dtype=jnp.float32) * (2.0 / Cin) ** 0.5
    gamma = 1.0 + 0.1 * jax.random.normal(kg, (Cout,), dtype=jnp.float32)
    beta = 0.1 * jax.random.normal(kb, (Cout,), dtype=jnp.float32)

    # stride = 1 (module default)
    out1 = jax.block_until_ready(downsample_layer_forward(x, weight, gamma, beta, stride=1))
    ref1 = _reference(x, weight, gamma, beta, stride=1)
    assert out1.shape == ref1.shape == (N, Cout, H, W)
    assert jnp.allclose(out1, ref1, atol=1e-4, rtol=1e-4)

    # stride = 2 (typical ResNet downsample configuration)
    out2 = jax.block_until_ready(downsample_layer_forward(x, weight, gamma, beta, stride=2))
    ref2 = _reference(x, weight, gamma, beta, stride=2)
    assert out2.shape == ref2.shape == (N, Cout, H // 2, W // 2)
    assert jnp.allclose(out2, ref2, atol=1e-4, rtol=1e-4)

    print("KERNEL_OK")
</pallas_src>

<mosaic_0001>
module attributes {stable_mosaic.version = 11 : i64} {
  func.func @_stats_kernel(%arg0: i32, %arg1: i32, %arg2: memref<1x4x256xf32, #tpu.memory_space<vmem>>, %arg3: memref<1x4x4xf32, #tpu.memory_space<vmem>>, %arg4: memref<1x4x1xf32, #tpu.memory_space<vmem>>) attributes {dimension_semantics = [#tpu.dimension_semantics<parallel>, #tpu.dimension_semantics<arbitrary>], iteration_bounds = array<i64: 1, 2>, scalar_prefetch = 0 : i64, scratch_operands = 0 : i64, tpu.core_type = #tpu.core_type<tc>, window_params = [{transform_indices = @transform_0, window_bounds = array<i64: 1, 4, 256>}, {transform_indices = @transform_1, window_bounds = array<i64: 1, 4, 4>}, {transform_indices = @transform_2, window_bounds = array<i64: 1, 4, 1>}]} {
    %c0_i32 = arith.constant 0 : i32
    %0 = arith.cmpi eq, %arg1, %c0_i32 : i32
    %1 = arith.extui %0 : i1 to i32
    %c0_i32_0 = arith.constant 0 : i32
    %2 = arith.cmpi ne, %1, %c0_i32_0 : i32
    scf.if %2 {
      %cst_16 = arith.constant 0.000000e+00 : f32
      %20 = vector.broadcast %cst_16 : f32 to vector<4x4xf32>
      %c0_17 = arith.constant 0 : index
      %c0_18 = arith.constant 0 : index
      %c0_19 = arith.constant 0 : index
      %21 = vector.load %arg3[%c0_17, %c0_18, %c0_19] : memref<1x4x4xf32, #tpu.memory_space<vmem>>, vector<1x4x4xf32>
      %22 = vector.shape_cast %21 : vector<1x4x4xf32> to vector<4x4xf32>
      %23 = vector.shape_cast %20 : vector<4x4xf32> to vector<1x4x4xf32>
      tpu.vector_store %arg3[%c0_17, %c0_18, %c0_19], %23 {strides = array<i32>} : memref<1x4x4xf32, #tpu.memory_space<vmem>>, vector<1x4x4xf32>,
      %cst_20 = arith.constant 0.000000e+00 : f32
      %24 = vector.broadcast %cst_20 : f32 to vector<4x1xf32>
      %c0_21 = arith.constant 0 : index
      %c0_22 = arith.constant 0 : index
      %c0_23 = arith.constant 0 : index
      %25 = vector.load %arg4[%c0_21, %c0_22, %c0_23] : memref<1x4x1xf32, #tpu.memory_space<vmem>>, vector<1x4x1xf32>
      %26 = vector.shape_cast %25 : vector<1x4x1xf32> to vector<4x1xf32>
      %27 = vector.shape_cast %24 : vector<4x1xf32> to vector<1x4x1xf32>
      tpu.vector_store %arg4[%c0_21, %c0_22, %c0_23], %27 {strides = array<i32>} : memref<1x4x1xf32, #tpu.memory_space<vmem>>, vector<1x4x1xf32>,
    } else {
    }
    %c0 = arith.constant 0 : index
    %c0_1 = arith.constant 0 : index
    %c0_2 = arith.constant 0 : index
    %3 = vector.load %arg2[%c0, %c0_1, %c0_2] : memref<1x4x256xf32, #tpu.memory_space<vmem>>, vector<1x4x256xf32>
    %4 = vector.shape_cast %3 : vector<1x4x256xf32> to vector<4x256xf32>
    %c0_3 = arith.constant 0 : index
    %c0_4 = arith.constant 0 : index
    %c0_5 = arith.constant 0 : index
    %5 = vector.load %arg3[%c0_3, %c0_4, %c0_5] : memref<1x4x4xf32, #tpu.memory_space<vmem>>, vector<1x4x4xf32>
    %6 = vector.shape_cast %5 : vector<1x4x4xf32> to vector<4x4xf32>
    %cst = arith.constant dense<0.000000e+00> : vector<4x4xf32>
    %7 = tpu.matmul %4, %4, %cst {dimension_numbers = #tpu.dot_dimension_numbers<[1], [1], [0], [0], [0, 0, 1, 0], [], []>} : vector<4x256xf32>, vector<4x256xf32>, vector<4x4xf32> -> vector<4x4xf32>
    %8 = arith.addf %6, %7 : vector<4x4xf32>
    %c0_6 = arith.constant 0 : index
    %c0_7 = arith.constant 0 : index
    %c0_8 = arith.constant 0 : index
    %9 = vector.load %arg3[%c0_6, %c0_7, %c0_8] : memref<1x4x4xf32, #tpu.memory_space<vmem>>, vector<1x4x4xf32>
    %10 = vector.shape_cast %9 : vector<1x4x4xf32> to vector<4x4xf32>
    %11 = vector.shape_cast %8 : vector<4x4xf32> to vector<1x4x4xf32>
    tpu.vector_store %arg3[%c0_6, %c0_7, %c0_8], %11 {strides = array<i32>} : memref<1x4x4xf32, #tpu.memory_space<vmem>>, vector<1x4x4xf32>,
    %c0_9 = arith.constant 0 : index
    %c0_10 = arith.constant 0 : index
    %c0_11 = arith.constant 0 : index
    %12 = vector.load %arg4[%c0_9, %c0_10, %c0_11] : memref<1x4x1xf32, #tpu.memory_space<vmem>>, vector<1x4x1xf32>
    %13 = vector.shape_cast %12 : vector<1x4x1xf32> to vector<4x1xf32>
    %cst_12 = arith.constant dense<0.000000e+00> : vector<4xf32>
    %14 = vector.multi_reduction <add>, %4, %cst_12 [1] : vector<4x256xf32> to vector<4xf32>
    %15 = vector.shape_cast %14 : vector<4xf32> to vector<4x1xf32>
    %16 = arith.addf %13, %15 : vector<4x1xf32>
    %c0_13 = arith.constant 0 : index
    %c0_14 = arith.constant 0 : index
    %c0_15 = arith.constant 0 : index
    %17 = vector.load %arg4[%c0_13, %c0_14, %c0_15] : memref<1x4x1xf32, #tpu.memory_space<vmem>>, vector<1x4x1xf32>
    %18 = vector.shape_cast %17 : vector<1x4x1xf32> to vector<4x1xf32>
    %19 = vector.shape_cast %16 : vector<4x1xf32> to vector<1x4x1xf32>
    tpu.vector_store %arg4[%c0_13, %c0_14, %c0_15], %19 {strides = array<i32>} : memref<1x4x1xf32, #tpu.memory_space<vmem>>, vector<1x4x1xf32>,
    return
  }
  func.func @transform_0(%arg0: i32, %arg1: i32) -> (i32, i32, i32) {
    %c0_i32 = arith.constant 0 : i32
    %c0_i32_0 = arith.constant 0 : i32
    return %arg1, %c0_i32, %arg0 : i32, i32, i32
  }
  func.func @transform_1(%arg0: i32, %arg1: i32) -> (i32, i32, i32) {
    %c0_i32 = arith.constant 0 : i32
    %c0_i32_0 = arith.constant 0 : i32
    %c0_i32_1 = arith.constant 0 : i32
    return %arg0, %c0_i32, %c0_i32_0 : i32, i32, i32
  }
  func.func @transform_2(%arg0: i32, %arg1: i32) -> (i32, i32, i32) {
    %c0_i32 = arith.constant 0 : i32
    %c0_i32_0 = arith.constant 0 : i32
    %c0_i32_1 = arith.constant 0 : i32
    return %arg0, %c0_i32, %c0_i32_0 : i32, i32, i32
  }
}

</mosaic_0001>

<bundles_post_ra>
// kernel: tpu_custom_call.1
= control target key start
LH: loop header
LB: loop body
LE: loop exit
PB: predicated region body
PF: predicated region fallthrough
CT: control target
= control target key end

     0   :  { %8 = vsyncpa [#allocation3], 0  ;;  %s707_s0 = inlined_call_operand.hbm [shape: f32[2,4,256], index: 0, kind: input, shape index: {}]   ;;  %s708_s1 = inlined_call_operand.hbm [shape: f32[1,4,4], index: 1, kind: output, shape index: {0}]   ;;  %s709_s2 = inlined_call_operand.vmem [shape: f32[1,4,1], index: 2, kind: output, shape index: {1}]  }
   0x1   :  { %10 = vsyncpa [#allocation3 + $0x1], 0 }
   0x2   :  { %11 = vsyncpa [#allocation4], 0  ;;  %s583_s9 = smov 0   ;;  %s585_s10 = smov 0  }
   0x3   :  { %s587_s11 = smov 0   ;;  %s589_s12 = smov 0  }
   0x4   :  { %s591_s13 = smov 0   ;;  %s593_s14 = smov 0  }
   0x5 LB: > { %s378_s15 = sadd.s32 4294967295, %s563_s14   ;;  %s26_s16 = sadd.s32 1, %s559_s13  ;;  %s563_s14 = sphi %s593_s14, %s17_s14   ;;  %s559_s13 = sphi %s591_s13, %s718_s13   ;;  %s555_s12 = sphi %s589_s12, %s717_s12   ;;  %s551_s11 = sphi %s587_s11, %s716_s11   ;;  %s547_s10 = sphi %s585_s10, %s715_s10   ;;  %s543_s9 = sphi %s583_s9, %s714_s9  }
   0x6   : > { %p27_p0 = scmp.ge.s32.totalorder %s26_s16, 2  ;;  %s38_s17 = sadd.s32 1, %s551_s11 }
   0x7   : > { %p45_p1 = scmp.ne.s32.totalorder %s551_s11, %s547_s10  ;;  %p46_p2 = scmp.eq.s32.totalorder %s563_s14, 0 }
   0x8   : > { %s720_s16 = smov (%p27_p0, %s26_s16), 0  ;;  %p51_p4 = scmp.ne.s32.totalorder %s547_s10, %s543_s9 }
   0x9   : > { %p619_p3 = por %p46_p2, %p45_p1  ;;  %s33_s19 = ssub.s32 %s559_s13, %s720_s16 }
   0xa   : > { %p52_p5 = scmp.eq.s32.totalorder %s378_s15, 0  ;;  %p36_p6 = scmp.eq.s32.totalorder %s33_s19, 0 }
   0xb   : > { %p403_p8 = scmp.lt.s32.totalorder %s563_s14, 2  ;;  %s127_s22 = sand.u32 1, %s551_s11  }
   0xc   : > { %p628_p7 = por %p52_p5, %p51_p4  ;;  %s392_s23 = sshll.u32 %s559_s13, 7 }
   0xd   : > { %s634_s21 = scalar_select %p36_p6, %s551_s11, %s38_s17  }
   0xe   : > { %s381_s24 = sshll.u32 %s127_s22, 3  ;;  %s139_s27 = scalar_lea.hbm %s707_s0, %s392_s23 }
   0xf   : > { %s131_s28 = scalar_lea.vmem [#allocation2], %s381_s24  ;;  %p643_p9 = pnand %p403_p8, %p619_p3 }
  0x10   : > { %s141_s29 = sshll.u32 %s131_s28, 4  ;;  %p384_p10 = scmp.ge.s32.totalorder %s563_s14, 1  ;;  %s142_s29 = int_to_ptr.vmem [resolvable:$true] %s141_s29 }
  0x11   : > { %p146_p11 = scmp.lt.s32.totalorder %s563_s14, 3  ;;  %s128_s3 = scalar_lea.sflag [#allocation3], %s127_s22 }
  0x12   : > { %p459_p12 = pneg %p643_p9  ;;  %s470_s4 = scalar_lea.vmem %s142_s29, 128 }
  0x13   : > { %p471_p13 = scmp.ne.s32.totalorder %s142_s29, %s470_s4  ;;  %s565_s5 = smov [#allocation2]  }
  0x14   : > { %s475_s6 = sshll.u32 %s565_s5, 4  ;;  %s476_s6 = int_to_ptr.vmem [resolvable:$false] %s475_s6 }
  0x15   : > { %p473_p0 = pnand %p471_p13, %p459_p12  ;;  %s477_s7 = scalar_lea.vmem %s476_s6, 256 }
  0x16   : > { %p478_p2 = scmp.lt.s32.totalorder %s142_s29, %s476_s6  ;;  %p479_p3 = scmp.lt.s32.totalorder %s477_s7, %s470_s4 }
  0x17   : > { %p474_p1 = pneg %p473_p0 }
  0x18   : > { %p480_p4 = por %p479_p3, %p478_p2 }
  0x1a   : > { %p481_p5 = pnand %p480_p4, %p474_p1 }
  0x1c   : > { %484 = shalt.err (!%p481_p5)
}
  0x1d   : > { %402 = dma.hbm_to_vmem [thread:$0]  (!%p643_p9), %s139_s27, 128, %s142_s29, %s128_s3  }
  0x1e   : > { %p147_p6 = pnand %p384_p10, %p146_p11 }
  0x1f   : > { %s152_s8 = sand.u32 (!%p147_p6), 1, %s547_s10  }
  0x20   : > { %150 = sbr.rel (%p147_p6) target bundleno = 255 (0xff), region = 24  ;;  %s385_s9 = sshll.u32 (!%p147_p6), %s152_s8, 3 }
  0x21   : > { %s153_s17 = scalar_lea.sflag (!%p147_p6), [#allocation3], %s152_s8  ;;  %s156_s18 = scalar_lea.vmem (!%p147_p6), [#allocation2], %s385_s9 }
  0x25   : > { %534 = dma.done.wait (%p628_p7), %s153_s17, 128  }
  0x26   : > { %536 = vsyncadd (%p628_p7), %s153_s17, 4294967168  ;;  %p386_p8 = scmp.ne.s32.totalorder %s555_s12, 0 }
  0x28   : > { %184 = sbr.rel (%p386_p8) target bundleno = 48 (0x30), region = 32 }
  0x2d   : > { %vm185_vm0 = vcmask 27648   ;;  %vm187_vm1 = vcmask 3072   ;;  %v566_v0 = vmov 0.0  }
  0x2e   : > { %186 = vst.msk [vmem:[#allocation5] sm:$0xf] %vm185_vm0, %v566_v0 }
  0x2f   : > { %188 = vst.msk [vmem:[%s709_s2] sm:$0xf] %vm187_vm1, %v566_v0 }
  0x30 PF: > { %v189_v1 = vld [vmem:[%s156_s18] sm:$0xff]  ;;  %vm268_vm2 = vcmask 1043456   ;;  %vm275_vm3 = vcmask 3072   ;;  %s567_s25 = smov [#allocation5]   ;;  %vm265_vm4 = vcmask 27648   ;;  %p674_p7 = scmp.eq.s32.totalorder %s378_s15, 1 }
  0x31   : > { %v192_v2 = vcombine.high %v189_v1, %v189_v1  ;;  %v269_v3 = vsel %vm268_vm2, %v189_v1, 0.0  ;;  %s290_s26 = sshll.u32 %s567_s25, 4  ;;  %s291_s26 = int_to_ptr.vmem [resolvable:$true] %s290_s26 }
  0x32   : > { %s485_s28 = scalar_lea.vmem %s291_s26, 64  ;;  %p492_p12 = scmp.lt.s32.totalorder %s291_s26, %s291_s26 }
  0x33   : > { %224 = vmatprep.subr.mxu0 %v192_v2  ;;  %258 = vmatprep.mubr.f32.mxu0 %v192_v2  ;;  %v270_v4 = vsel %vm268_vm2, %v192_v2, 0.0  ;;  %p486_p9 = scmp.ne.s32.totalorder %s291_s26, %s485_s28  ;;  %p493_p13 = scmp.lt.s32.totalorder %s485_s28, %s485_s28 }
  0x34   : > { %225 = vmatpush1.xpose.msra.mxu0 %v189_v1  ;;  %v271_v5 = vadd.f32 %v270_v4, %v269_v3 }
  0x35   : > { %v190_v9 = vld [vmem:[#allocation5] sm:$0xf]  ;;  %p487_p10 = pnand %p486_p9, %p674_p7  ;;  %p494_p0 = por %p493_p13, %p492_p12 }
  0x36   : > { %272 = vadd.xlane.f32.xlu0 %v271_v5  ;;  %v267_v6 = vld [vmem:[%s709_s2] sm:$0xf] }
  0x37   : > { %259 = vmatmul.mubr.f32.vlgmr.msra.gmra.mxu0 %v189_v1  ;;  %p488_p11 = pneg %p487_p10 }
  0x39   : > { %p495_p1 = pnand %p494_p0, %p488_p11 }
  0xbf   : > { %v273_v7 = vpop.xlane.xlu0 %272 }
  0xc0   : > { %v274_v8 = vadd.f32 %v273_v7, %v267_v6 }
  0xc2   : > { %276 = vst.msk [vmem:[%s709_s2] sm:$0xf] %vm275_vm3, %v274_v8 }
  0xf7   : > { %v260_v10 = vpop.f32.mrf.mxu0 }
  0xf8   : > { %v264_v11 = vadd.f32 %v260_v10, %v190_v9 }
  0xf9   : > { %v262_v12 = vpop.f32.mrf.mxu0 }
  0xfa   : > { %266 = vst.msk [vmem:[#allocation5] sm:$0xf] %vm265_vm4, %v264_v11 }
  0xfb   : > { %498 = shalt.err (!%p495_p1)
}
  0xfc   : > { %396 = dma.vmem_to_hbm [thread:$0]  (%p674_p7), %s291_s26, 64, %s708_s1, [#allocation4]  }
  0xfd   : > { %538 = dma.done.wait (%p674_p7), [#allocation4], 64  }
  0xfe   : > { %540 = vsyncadd (%p674_p7), [#allocation4], 4294967232 }
  0xff PF: > { %s17_s14 = sadd.s32 1, %s563_s14   ;;  %s714_s9 = smov %s547_s10 }
 0x100   : > { %p14_p2 = scmp.ge.s32.totalorder %s17_s14, 4   ;;  %s715_s10 = smov %s551_s11 }
 0x101   : > { %s716_s11 = smov %s634_s21  ;;  %s717_s12 = smov %s559_s13 }
 0x102   : > { %s718_s13 = smov %s720_s16  ;;  %16 = sbr.rel (!%p14_p2) target bundleno = 5 (0x5), region = 78 }
 0x107   :  { %313 = vsyncpa [#allocation3], 1 }
 0x108   :  { %315 = vsyncpa [#allocation3 + $0x1], 1 }
 0x109   :  { %316 = vsyncpa [#allocation4], 1 }
 0x10a   :  { %318 = vsyncpa [#allocation4 + $0x1], 1 }

</bundles_post_ra>
